<compile_context>
chip_gen: v7x
topology: tpu7x:2x2x1
jax: 0.10.0
libtpu: 0.0.40
codegen_flags: <defaults>
</compile_context>

<pallas_src>
import math

import jax
import jax.numpy as jnp
from jax.experimental import pallas as pl
from jax.experimental.pallas import tpu as pltpu

_LANE = 128
_SUBLANE = 8
_NEG_FILL = -1e30  # padded logits -> exp() == 0, leaves the lse untouched
                   # (keep finite: -inf would give inf-inf -> NaN in shifted)


def _round_up(x, m):
    return (x + m - 1) // m * m


def _cdiv(a, b):
    return -(-a // b)


def _linear_logsoftmax_kernel(x_ref, w_ref, b_ref, o_ref):
    # x_ref: [tm, IN]  w_ref: [IN, OUT_PAD]  b_ref: [1, OUT_PAD]  o_ref: [tm, OUT]
    out_cols = o_ref.shape[-1]
    logits = jnp.dot(x_ref[...], w_ref[...],
                     preferred_element_type=jnp.float32) + b_ref[...]
    m = jnp.max(logits, axis=-1, keepdims=True)
    shifted = logits - m
    lse = jnp.log(jnp.sum(jnp.exp(shifted), axis=-1, keepdims=True))
    # Only the real columns ever leave VMEM.
    o_ref[...] = (shifted[:, :out_cols] - lse).astype(o_ref.dtype)


def _pallas_forward(x, w_t, b, *, block_b):
    B, IN = x.shape
    OUT = w_t.shape[1]

    # ---- Lane-dense padding of the (VMEM-resident) weight / bias only.
    OUT_PAD = _round_up(OUT, _LANE)
    w_pad = jnp.zeros((IN, OUT_PAD), jnp.float32).at[:, :OUT].set(
        w_t.astype(jnp.float32))
    b_pad = jnp.full((1, OUT_PAD), _NEG_FILL, jnp.float32).at[0, :OUT].set(
        b.astype(jnp.float32))

    # ---- Batch tiling: pad B only to a multiple of 8, then pick an (even,
    # when possible) tile count so v7x gets both TensorCores, and derive tm.
    B_8 = _round_up(B, _SUBLANE)
    n_tiles = max(1, _cdiv(B_8, block_b))
    if n_tiles == 1 and B_8 >= 2 * _SUBLANE:
        n_tiles = 2                      # v7x: use both TCs (no-op on v5e/v6e)
    if n_tiles > 1 and n_tiles % 2 == 1:
        n_tiles += 1                     # keep TC load balance even
    tm = _round_up(_cdiv(B_8, n_tiles), _SUBLANE)
    B_PAD = tm * n_tiles                 # waste is O(8 * n_tiles) rows, tiny

    if B_PAD != B:
        x = jnp.zeros((B_PAD, IN), x.dtype).at[:B, :].set(x)

    cost = pl.CostEstimate(
        flops=2 * B_PAD * IN * OUT_PAD,
        transcendentals=B_PAD * (OUT_PAD + 1),   # exp per padded elem + log per row
        bytes_accessed=4 * (B_PAD * IN + IN * OUT_PAD + OUT_PAD + B_PAD * OUT),
    )

    out = pl.pallas_call(
        _linear_logsoftmax_kernel,
        out_shape=jax.ShapeDtypeStruct((B_PAD, OUT), jnp.float32),
        grid_spec=pltpu.PrefetchScalarGridSpec(
            num_scalar_prefetch=0,
            grid=(n_tiles,),
            in_specs=[
                pl.BlockSpec((tm, IN), lambda i: (i, 0)),       # streams per tile
                pl.BlockSpec((IN, OUT_PAD), lambda i: (0, 0)),  # VMEM-resident
                pl.BlockSpec((1, OUT_PAD), lambda i: (0, 0)),   # VMEM-resident
            ],
            # Last block dim == full array dim (OUT), so the narrow output
            # block is legal; only 12 columns/row of HBM writeback.
            out_specs=pl.BlockSpec((tm, OUT), lambda i: (i, 0)),
        ),
        compiler_params=pltpu.CompilerParams(
            dimension_semantics=("parallel",),     # independent batch tiles
            vmem_limit_bytes=32 * 1024 * 1024,     # lifts v5e's 16 MiB default
        ),
        cost_estimate=cost,
    )(x, w_pad, b_pad)

    return out if B_PAD == B else out[:B]


def network_forward(x, w_t, b, *, block_b=4096, min_pallas_batch=1024,
                    force_pallas=False):
    """log_softmax(x @ W + b, axis=-1).

    x:   [B, IN]   f32
    w_t: [IN, OUT] f32 (transposed PyTorch weight)
    b:   [OUT]     f32
    """
    B = x.shape[0]
    if not force_pallas and B < min_pallas_batch:
        # Tiny batches: launch/step overhead dominates; XLA fuses this fine.
        return jax.nn.log_softmax(x @ w_t + b, axis=-1)
    return _pallas_forward(x, w_t, b, block_b=block_b)


def init_params(key, input_size=32, output_size=12):
    # xavier_uniform_ with gain('linear') == 1.0:
    #   bound = sqrt(6 / (fan_in + fan_out))
    kw, kb = jax.random.split(key)
    bound_w = math.sqrt(6.0 / (input_size + output_size))
    # PyTorch weight shape is [OUT, IN]; we store transposed [IN, OUT].
    w = jax.random.uniform(kw, (output_size, input_size), jnp.float32,
                           minval=-bound_w, maxval=bound_w)
    # nn.Linear default bias init: U(-1/sqrt(fan_in), 1/sqrt(fan_in))
    bound_b = 1.0 / math.sqrt(input_size)
    b = jax.random.uniform(kb, (output_size,), jnp.float32,
                           minval=-bound_b, maxval=bound_b)
    return w.T, b  # [IN, OUT], [OUT]


if __name__ == "__main__":
    input_size, output_size = 32, 12

    key = jax.random.PRNGKey(0)
    kx, kp, kx2 = jax.random.split(key, 3)
    w_t, b = init_params(kp, input_size, output_size)

    # --- Small-shape demo (batch=8): force the Pallas path.
    batch = 8
    x = jax.random.normal(kx, (batch, input_size), jnp.float32)
    out = jax.block_until_ready(network_forward(x, w_t, b, force_pallas=True))
    ref = jax.nn.log_softmax(x @ w_t + b, axis=-1)
    assert out.shape == (batch, output_size)
    assert jnp.allclose(jnp.sum(jnp.exp(out), axis=-1), 1.0, atol=1e-4)
    assert jnp.allclose(out, ref, atol=1e-5, rtol=1e-5)

    # --- Larger batch: exercises tiling, 2-tile megacore split, narrow output.
    batch2 = 2000
    x2 = jax.random.normal(kx2, (batch2, input_size), jnp.float32)
    out2 = jax.block_until_ready(network_forward(x2, w_t, b))
    ref2 = jax.nn.log_softmax(x2 @ w_t + b, axis=-1)
    assert out2.shape == (batch2, output_size)
    assert jnp.allclose(out2, ref2, atol=1e-5, rtol=1e-5)

    print("KERNEL_OK")
</pallas_src>

<mosaic_0001>
module attributes {stable_mosaic.version = 11 : i64} {
  func.func @_linear_logsoftmax_kernel(%arg0: i32, %arg1: memref<8x32xf32, #tpu.memory_space<vmem>>, %arg2: memref<32x128xf32, #tpu.memory_space<vmem>>, %arg3: memref<1x128xf32, #tpu.memory_space<vmem>>, %arg4: memref<8x12xf32, #tpu.memory_space<vmem>>) attributes {dimension_semantics = [#tpu.dimension_semantics<parallel>], iteration_bounds = array<i64: 1>, scalar_prefetch = 0 : i64, scratch_operands = 0 : i64, tpu.core_type = #tpu.core_type<tc>, window_params = [{transform_indices = @transform_0, window_bounds = array<i64: 8, 32>}, {pipeline_mode = #tpu.pipeline_mode<synchronous>, transform_indices = @transform_1, window_bounds = array<i64: 32, 128>}, {pipeline_mode = #tpu.pipeline_mode<synchronous>, transform_indices = @transform_2, window_bounds = array<i64: 1, 128>}, {transform_indices = @transform_3, window_bounds = array<i64: 8, 12>}]} {
    %c0 = arith.constant 0 : index
    %c0_0 = arith.constant 0 : index
    %0 = vector.load %arg1[%c0, %c0_0] : memref<8x32xf32, #tpu.memory_space<vmem>>, vector<8x32xf32>
    %c0_1 = arith.constant 0 : index
    %c0_2 = arith.constant 0 : index
    %1 = vector.load %arg2[%c0_1, %c0_2] : memref<32x128xf32, #tpu.memory_space<vmem>>, vector<32x128xf32>
    %cst = arith.constant dense<0.000000e+00> : vector<8x128xf32>
    %2 = tpu.matmul %0, %1, %cst {dimension_numbers = #tpu.dot_dimension_numbers<[1], [0], [0], [1], [0, 0, 1, 1], [], []>} : vector<8x32xf32>, vector<32x128xf32>, vector<8x128xf32> -> vector<8x128xf32>
    %c0_3 = arith.constant 0 : index
    %c0_4 = arith.constant 0 : index
    %3 = vector.load %arg3[%c0_3, %c0_4] : memref<1x128xf32, #tpu.memory_space<vmem>>, vector<1x128xf32>
    %4 = vector.broadcast %3 : vector<1x128xf32> to vector<8x128xf32>
    %5 = arith.addf %2, %4 : vector<8x128xf32>
    %cst_5 = arith.constant dense<0xFF800000> : vector<8xf32>
    %6 = vector.multi_reduction <maximumf>, %5, %cst_5 [1] : vector<8x128xf32> to vector<8xf32>
    %7 = vector.shape_cast %6 : vector<8xf32> to vector<8x1xf32>
    %8 = vector.broadcast %7 : vector<8x1xf32> to vector<8x128xf32>
    %9 = arith.subf %5, %8 : vector<8x128xf32>
    %10 = math.exp %9 : vector<8x128xf32>
    %cst_6 = arith.constant dense<0.000000e+00> : vector<8xf32>
    %11 = vector.multi_reduction <add>, %10, %cst_6 [1] : vector<8x128xf32> to vector<8xf32>
    %12 = vector.shape_cast %11 : vector<8xf32> to vector<8x1xf32>
    %13 = math.log %12 : vector<8x1xf32>
    %14 = vector.extract_strided_slice %9 {offsets = [0, 0], sizes = [8, 12], strides = [1, 1]} : vector<8x128xf32> to vector<8x12xf32>
    %15 = vector.broadcast %13 : vector<8x1xf32> to vector<8x12xf32>
    %16 = arith.subf %14, %15 : vector<8x12xf32>
    %c0_7 = arith.constant 0 : index
    %c0_8 = arith.constant 0 : index
    %17 = vector.load %arg4[%c0_7, %c0_8] : memref<8x12xf32, #tpu.memory_space<vmem>>, vector<8x12xf32>
    tpu.vector_store %arg4[%c0_7, %c0_8], %16 {strides = array<i32>} : memref<8x12xf32, #tpu.memory_space<vmem>>, vector<8x12xf32>,
    return
  }
  func.func @transform_0(%arg0: i32) -> (i32, i32) {
    %c0_i32 = arith.constant 0 : i32
    %c0_i32_0 = arith.constant 0 : i32
    return %arg0, %c0_i32 : i32, i32
  }
  func.func @transform_1(%arg0: i32) -> (i32, i32) {
    %c0_i32 = arith.constant 0 : i32
    %c0_i32_0 = arith.constant 0 : i32
    %c0_i32_1 = arith.constant 0 : i32
    return %c0_i32, %c0_i32_0 : i32, i32
  }
  func.func @transform_2(%arg0: i32) -> (i32, i32) {
    %c0_i32 = arith.constant 0 : i32
    %c0_i32_0 = arith.constant 0 : i32
    %c0_i32_1 = arith.constant 0 : i32
    return %c0_i32, %c0_i32_0 : i32, i32
  }
  func.func @transform_3(%arg0: i32) -> (i32, i32) {
    %c0_i32 = arith.constant 0 : i32
    %c0_i32_0 = arith.constant 0 : i32
    return %arg0, %c0_i32 : i32, i32
  }
}

</mosaic_0001>

<bundles_post_ra>
// kernel: tpu_custom_call.1
= control target key start
LH: loop header
LB: loop body
LE: loop exit
PB: predicated region body
PF: predicated region fallthrough
CT: control target
= control target key end

     0   :  { %8 = vsyncpa [#allocation3], 0  ;;  %s337_s0 = inlined_call_operand.hbm [shape: f32[8,32], index: 0, kind: input, shape index: {}]   ;;  %s338_s1 = inlined_call_operand.hbm [shape: f32[32,128], index: 1, kind: input, shape index: {}]   ;;  %s339_s2 = inlined_call_operand.vmem [shape: f32[1,128], index: 2, kind: input, shape index: {}]   ;;  %s340_s3 = inlined_call_operand.hbm [shape: f32[8,12], index: 3, kind: output, shape index: {}]  }
   0x1   :  { %9 = vsyncpa [#allocation6], 0 }
   0x2   :  { %10 = vsyncpa [#allocation4], 0  ;;  %s263_s12 = smov [#allocation2]   ;;  %s264_s14 = smov [#allocation5]  }
   0x3   :  { %s17_s13 = sshll.u32 %s263_s12, 4  ;;  %s26_s15 = sshll.u32 %s264_s14, 4  ;;  %s18_s13 = int_to_ptr.vmem [resolvable:$true] %s17_s13  ;;  %s291_s15 = int_to_ptr.vmem [resolvable:$true] %s26_s15 }
   0x4   :  { %s191_s18 = scalar_lea.hbm %s337_s0, 128 }
   0x5   :  { %p192_p0 = scmp.ne.s32.totalorder %s337_s0, %s191_s18  ;;  %p195_p1 = scmp.lt.u32.totalorder %s191_s18, %s337_s0 }
   0x7   :  { %p197_p2 = pnand %p195_p1, %p192_p0 }
   0x9   :  { %200 = shalt.err (!%p197_p2)
}
   0xa   :  { %s201_s23 = scalar_lea.vmem %s18_s13, 128  ;;  %p206_p4 = scmp.lt.s32.totalorder %s18_s13, %s18_s13 }
   0xb   :  { %p202_p3 = scmp.ne.s32.totalorder %s18_s13, %s201_s23  ;;  %p207_p5 = scmp.lt.s32.totalorder %s201_s23, %s201_s23 }
   0xd   :  { %p208_p6 = por %p207_p5, %p206_p4 }
   0xf   :  { %p209_p7 = pnand %p208_p6, %p202_p3 }
  0x11   :  { %212 = shalt.err (!%p209_p7)
}
  0x12   :  { %20 = dma.hbm_to_vmem [thread:$0]  %s337_s0, 128, %s18_s13, [#allocation3]  }
  0x13   :  { %s213_s28 = scalar_lea.hbm %s338_s1, 512 }
  0x14   :  { %p214_p8 = scmp.ne.s32.totalorder %s338_s1, %s213_s28  ;;  %p217_p9 = scmp.lt.u32.totalorder %s213_s28, %s338_s1 }
  0x16   :  { %p219_p10 = pnand %p217_p9, %p214_p8 }
  0x18   :  { %222 = shalt.err (!%p219_p10)
}
  0x19   :  { %s223_s6 = scalar_lea.vmem %s291_s15, 512  ;;  %p228_p12 = scmp.lt.s32.totalorder %s291_s15, %s291_s15 }
  0x1a   :  { %p224_p11 = scmp.ne.s32.totalorder %s291_s15, %s223_s6  ;;  %p229_p13 = scmp.lt.s32.totalorder %s223_s6, %s223_s6 }
  0x1c   :  { %p230_p0 = por %p229_p13, %p228_p12 }
  0x1e   :  { %p231_p1 = pnand %p230_p0, %p224_p11 }
  0x20   :  { %234 = shalt.err (!%p231_p1)
}
  0x21   :  { %s265_s0 = smov 128   ;;  %s266_s7 = smov 8  }
  0x22   :  { %32 = dma.hbm_to_vmem [thread:$0]  %s338_s1, 512, %s291_s15, [#allocation6], %s265_s0, %s265_s0, %s266_s7  }
  0x23   :  { %257 = dma.done.wait [#allocation3], 128  }
  0x24   :  { %258 = vsyncadd [#allocation3], 4294967168 }
  0x25   :  { %259 = dma.done.wait [#allocation6], 512  }
  0x26   :  { %260 = vsyncadd [#allocation6], 4294966784  ;;  %v267_v0 = vmov 0.0|0.0   ;;  %vm268_vm0 = vmmov 0   ;;  %v269_v1 = vmov 0.0   ;;  %v42_v2 = vld [vmem:[#allocation5] sm:$0xff] }
  0x27   :  { %173 = vmatprep.subr.bf16.mxu0 %v267_v0  ;;  %170 = vmatprep.mubr.msk.f32.mxu0 %vm268_vm0, %v269_v1  ;;  %v43_v3 = vld [vmem:[#allocation5 + $0x8] sm:$0xff]  ;;  %v44_v4 = vld [vmem:[#allocation5 + $0x10] sm:$0xff]  ;;  %v45_v6 = vld [vmem:[#allocation5 + $0x18] sm:$0xff]  ;;  %vm53_vm1 = vcmask 261120   ;;  %s270_s11 = smov [#allocation7]   ;;  %vm137_vm2 = vcmask 97280  }
  0x28   :  { %v174_v5 = vpack.c.bf16 %v43_v3, %v42_v2  ;;  %v177_v7 = vpack.c.bf16 %v45_v6, %v44_v4  ;;  %v41_v8 = vld [vmem:[#allocation2] sm:$0xff]  ;;  %s145_s12 = sshll.u32 %s270_s11, 4  ;;  %s146_s12 = int_to_ptr.vmem [resolvable:$true] %s145_s12 }
  0x29   :  { %v155_v9 = vld [vmem:[%s339_s2] ss:$0 sm:$0xff]  ;;  %s235_s2 = scalar_lea.vmem %s146_s12, 128  ;;  %p240_p3 = scmp.lt.s32.totalorder %s146_s12, %s146_s12 }
  0x2a   :  { %175 = vmatpush3.bf16.msra.mxu0 %v174_v5  ;;  %p236_p2 = scmp.ne.s32.totalorder %s146_s12, %s235_s2  ;;  %p241_p4 = scmp.lt.s32.totalorder %s235_s2, %s235_s2 }
  0x2b   :  { %176 = vmatprep.subr.bf16.mxu0 %v267_v0 }
  0x2c   :  { %p242_p5 = por %p241_p4, %p240_p3 }
  0x2e   :  { %178 = vmatpush3.bf16.msra.mxu0 %v177_v7  ;;  %p243_p6 = pnand %p242_p5, %p236_p2 }
  0x31   :  { %171 = vmatmul.mubr.msk.f32.vlgmr.msra.gmra.mrb[0].mxu0 %vm53_vm1, %v41_v8 }
 0x104   :  { %v123_v10 = vpop.f32.mrb[0].mxu0 }
 0x105   :  { %v124_v11 = vadd.f32 %v155_v9, %v123_v10  ;;  %v172_v12 = vpop.f32.mrb[1].mxu0 }
 0x107   :  { %127 = vmax.xlane.f32.xlu0 %v124_v11 }
 0x194   :  { %v128_v13 = vpop.xlane.xlu0 %127 }
 0x195   :  { %v129_v14 = vsub.f32 %v124_v11, %v128_v13 }
 0x197   :  { %v130_v15 = vmul.f32 1.442695, %v129_v14 }
 0x199   :  { %187 = vpow2.f32 %v130_v15 }
 0x1a3   :  { %v188_v16 = vpop.eup %187 }
 0x1a4   :  { %132 = vadd.xlane.f32.xlu0 %v188_v16 }
 0x231   :  { %v133_v17 = vpop.xlane.xlu0 %132 }
 0x232   :  { %189 = vlog2.f32 %v133_v17 }
 0x23c   :  { %v190_v18 = vpop.eup %189 }
 0x23d   :  { %v135_v19 = vmul.f32 0.6931472, %v190_v18 }
 0x23f   :  { %v136_v20 = vsub.f32 %v129_v14, %v135_v19 }
 0x241   :  { %138 = vst.msk [vmem:[#allocation7] sm:$0xff] %vm137_vm2, %v136_v20 }
 0x242   :  { %246 = shalt.err (!%p243_p6)
}
 0x243   :  { %s247_s15 = scalar_lea.hbm %s340_s3, 128 }
 0x244   :  { %p248_p7 = scmp.ne.s32.totalorder %s340_s3, %s247_s15  ;;  %p251_p8 = scmp.lt.u32.totalorder %s247_s15, %s340_s3 }
 0x246   :  { %p253_p9 = pnand %p251_p8, %p248_p7 }
 0x248   :  { %256 = shalt.err (!%p253_p9)
}
 0x249   :  { %148 = dma.vmem_to_hbm [thread:$0]  %s146_s12, 128, %s340_s3, [#allocation4]  }
 0x24a   :  { %261 = dma.done.wait [#allocation4], 128  }
 0x24b   :  { %262 = vsyncadd [#allocation4], 4294967168 }
 0x24c   :  { %152 = vsyncpa [#allocation3], 1 }
 0x24d   :  { %153 = vsyncpa [#allocation6], 1 }
 0x24e   :  { %154 = vsyncpa [#allocation4], 1 }

</bundles_post_ra>
